<compile_context>
chip_gen: v7x
topology: tpu7x:2x2x1
jax: 0.10.0
libtpu: 0.0.40
codegen_flags: <defaults>
</compile_context>

<pallas_src>
import jax
import jax.numpy as jnp
from jax.experimental import pallas as pl
from jax.experimental.pallas import tpu as pltpu


def critic_kernel(state_ref, frame_ref, w1_ref, wz_ref, b_ref, w2_ref, out_ref):
    # Cast activations to bf16 inside the kernel (MXU operands); f32 accumulate.
    frame_bf = frame_ref[...].astype(jnp.bfloat16)      # (tb, n_obs)
    state_bf = state_ref[...].astype(jnp.bfloat16)      # (tb, H)

    b1 = b_ref[0:1, :]                                   # (1, H) f32
    bz = b_ref[1:2, :]                                   # (1, H) f32
    b2 = b_ref[2:3, 0:1]                                 # (1, 1) f32

    # Layer 1: frame -> hidden, tanh (tanh stays f32: v5e EUP has no bf16).
    h = jnp.tanh(
        jnp.dot(frame_bf, w1_ref[...], preferred_element_type=jnp.float32) + b1
    )                                                    # (tb, H) f32

    # Layer z: cat([h, state]) @ Wz.T + bz as ONE K=2H matmul.
    hz = jnp.concatenate([h.astype(jnp.bfloat16), state_bf], axis=-1)  # (tb, 2H)
    z = jnp.tanh(
        jnp.dot(hz, wz_ref[...], preferred_element_type=jnp.float32) + bz
    )                                                    # (tb, H) f32

    # Head (out_features = 1) produced lane-dense as a (1, tb) row:
    #   out[0, t] = sum_h w2[0, h] * z[t, h] + b2    (w2 @ z.T, trans_b form)
    head = jax.lax.dot_general(
        w2_ref[...], z,
        dimension_numbers=(((1,), (1,)), ((), ())),
        preferred_element_type=jnp.float32)              # (1, tb) f32
    out_ref[0] = head + b2                               # block is (1, 1, tb)


def _pick_tb(batch):
    """Largest batch tile <= 1024 that divides B and is a multiple of 8,
    preferring >= 2 tiles so both v7x TensorCores stay busy."""
    cands = [t for t in range(8, min(batch, 1024) + 1, 8) if batch % t == 0]
    if not cands:
        return batch                    # awkward batch: one whole-batch tile
    multi = [t for t in cands if batch // t >= 2]
    return max(multi) if multi else max(cands)


def critic_forward(state, frame, params, *, tb=None):
    """state: (B, H) f32, frame: (B, n_obs) f32 -> critic value (B, 1) f32."""
    B, H = state.shape
    n_obs = frame.shape[1]
    w1, wz, b_pack, w2_row = params

    if tb is None:
        tb = _pick_tb(B)
    assert B % tb == 0, (B, tb)
    assert tb == B or tb % 8 == 0, (B, tb)
    num_tiles = B // tb

    cost = pl.CostEstimate(
        flops=2 * B * (n_obs * H + 2 * H * H + H),
        transcendentals=2 * B * H,
        bytes_accessed=(4 * B * (H + n_obs + 1)          # f32 activations + out
                        + 2 * (n_obs * H + 2 * H * H)    # bf16 weights
                        + 4 * (3 * H + H)),              # f32 biases + w2 row
    )

    out = pl.pallas_call(
        critic_kernel,
        out_shape=jax.ShapeDtypeStruct((num_tiles, 1, tb), jnp.float32),
        grid=(num_tiles,),
        in_specs=[
            pl.BlockSpec((tb, H), lambda i: (i, 0)),        # state  f32, batch tile
            pl.BlockSpec((tb, n_obs), lambda i: (i, 0)),    # frame  f32, batch tile
            pl.BlockSpec(w1.shape, lambda i: (0, 0)),       # W1.T   (n_obs, H) bf16
            pl.BlockSpec(wz.shape, lambda i: (0, 0)),       # Wz.T   (2H, H)   bf16
            pl.BlockSpec(b_pack.shape, lambda i: (0, 0)),   # [b1; bz; b2]  (3, H) f32
            pl.BlockSpec(w2_row.shape, lambda i: (0, 0)),   # W2 row (1, H) f32
        ],
        out_specs=pl.BlockSpec((1, 1, tb), lambda i: (i, 0, 0)),
        compiler_params=pltpu.CompilerParams(
            dimension_semantics=("parallel",)),
        cost_estimate=cost,
    )(state, frame, w1, wz, b_pack, w2_row)

    return out.reshape(B, 1)


def init_params(key, n_observations, n_hidden):
    """Deterministic synthetic parameters (PyTorch-equivalent, transposed layout)."""
    ks = jax.random.split(key, 6)
    scale = 0.1
    # linear: (n_obs -> H), stored as W1.T
    w1 = (scale * jax.random.normal(ks[0], (n_observations, n_hidden),
                                    jnp.float32)).astype(jnp.bfloat16)
    b1 = scale * jax.random.normal(ks[1], (n_hidden,), jnp.float32)
    # linear_z: (2H -> H), stored as a single fused Wz.T (rows 0..H-1 multiply
    # the frame-hidden h, rows H..2H-1 multiply state -- matches cat([h, state])).
    wz = (scale * jax.random.normal(ks[2], (2 * n_hidden, n_hidden),
                                    jnp.float32)).astype(jnp.bfloat16)
    bz = scale * jax.random.normal(ks[3], (n_hidden,), jnp.float32)
    # linear2: (H -> 1), stored as a (1, H) row
    w2_row = scale * jax.random.normal(ks[4], (1, n_hidden), jnp.float32)
    b2 = scale * jax.random.normal(ks[5], (), jnp.float32)
    # Packed biases: row 0 = b1, row 1 = bz, row 2 = b2 broadcast (VMEM, no SMEM operand).
    b_pack = jnp.stack([b1, bz, jnp.full((n_hidden,), b2, jnp.float32)], axis=0)
    # TODO(synk): linear_state (H -> H) exists in __init__ but is unused in
    # forward, so it is intentionally not instantiated here.
    return (w1, wz, b_pack, w2_row)


def reference_forward(state, frame, params):
    """Plain-JAX reference with identical math (bf16 operands, f32 accumulate)."""
    w1, wz, b_pack, w2_row = params
    fb = frame.astype(jnp.bfloat16)
    sb = state.astype(jnp.bfloat16)
    h = jnp.tanh(jnp.dot(fb, w1, preferred_element_type=jnp.float32)
                 + b_pack[0:1, :])
    hz = jnp.concatenate([h.astype(jnp.bfloat16), sb], axis=-1)
    z = jnp.tanh(jnp.dot(hz, wz, preferred_element_type=jnp.float32)
                 + b_pack[1:2, :])
    return jnp.dot(z, w2_row.T) + b_pack[2, 0]           # (B, 1)


if __name__ == "__main__":
    B = 64               # batch; auto tile-pick gives tb=32 -> grid (2,)
    n_observations = 16
    n_hidden = 128       # lane-dense hidden dim (multiple of 128)

    key = jax.random.PRNGKey(0)
    k_params, k_state, k_frame = jax.random.split(key, 3)

    params = init_params(k_params, n_observations, n_hidden)
    # initial_state(B) would be zeros; use random state to exercise that path too.
    state = jax.random.normal(k_state, (B, n_hidden), jnp.float32)
    frame = jax.random.normal(k_frame, (B, n_observations), jnp.float32)

    out = critic_forward(state, frame, params)
    out = jax.block_until_ready(out)

    ref = reference_forward(state, frame, params)
    assert out.shape == (B, 1), out.shape
    assert jnp.allclose(out, ref, atol=2e-3, rtol=2e-3), (out, ref)

    print("KERNEL_OK")
</pallas_src>

<mosaic_0001>
module attributes {stable_mosaic.version = 11 : i64} {
  func.func @critic_kernel(%arg0: i32, %arg1: memref<32x128xf32, #tpu.memory_space<vmem>>, %arg2: memref<32x16xf32, #tpu.memory_space<vmem>>, %arg3: memref<16x128xbf16, #tpu.memory_space<vmem>>, %arg4: memref<256x128xbf16, #tpu.memory_space<vmem>>, %arg5: memref<3x128xf32, #tpu.memory_space<vmem>>, %arg6: memref<1x128xf32, #tpu.memory_space<vmem>>, %arg7: memref<1x1x32xf32, #tpu.memory_space<vmem>>) attributes {dimension_semantics = [#tpu.dimension_semantics<parallel>], iteration_bounds = array<i64: 2>, scalar_prefetch = 0 : i64, scratch_operands = 0 : i64, tpu.core_type = #tpu.core_type<tc>, window_params = [{transform_indices = @transform_0, window_bounds = array<i64: 32, 128>}, {transform_indices = @transform_1, window_bounds = array<i64: 32, 16>}, {pipeline_mode = #tpu.pipeline_mode<synchronous>, transform_indices = @transform_2, window_bounds = array<i64: 16, 128>}, {pipeline_mode = #tpu.pipeline_mode<synchronous>, transform_indices = @transform_3, window_bounds = array<i64: 256, 128>}, {pipeline_mode = #tpu.pipeline_mode<synchronous>, transform_indices = @transform_4, window_bounds = array<i64: 3, 128>}, {pipeline_mode = #tpu.pipeline_mode<synchronous>, transform_indices = @transform_5, window_bounds = array<i64: 1, 128>}, {transform_indices = @transform_6, window_bounds = array<i64: 1, 1, 32>}]} {
    %c0 = arith.constant 0 : index
    %c0_0 = arith.constant 0 : index
    %0 = vector.load %arg2[%c0, %c0_0] : memref<32x16xf32, #tpu.memory_space<vmem>>, vector<32x16xf32>
    %1 = arith.truncf %0 : vector<32x16xf32> to vector<32x16xbf16>
    %c0_1 = arith.constant 0 : index
    %c0_2 = arith.constant 0 : index
    %2 = vector.load %arg1[%c0_1, %c0_2] : memref<32x128xf32, #tpu.memory_space<vmem>>, vector<32x128xf32>
    %3 = arith.truncf %2 : vector<32x128xf32> to vector<32x128xbf16>
    %c0_3 = arith.constant 0 : index
    %c0_4 = arith.constant 0 : index
    %4 = vector.load %arg5[%c0_3, %c0_4] : memref<3x128xf32, #tpu.memory_space<vmem>>, vector<1x128xf32>
    %c1 = arith.constant 1 : index
    %c0_5 = arith.constant 0 : index
    %5 = vector.load %arg5[%c1, %c0_5] : memref<3x128xf32, #tpu.memory_space<vmem>>, vector<1x128xf32>
    %c2 = arith.constant 2 : index
    %c0_6 = arith.constant 0 : index
    %6 = vector.load %arg5[%c2, %c0_6] : memref<3x128xf32, #tpu.memory_space<vmem>>, vector<1x1xf32>
    %c0_7 = arith.constant 0 : index
    %c0_8 = arith.constant 0 : index
    %7 = vector.load %arg3[%c0_7, %c0_8] : memref<16x128xbf16, #tpu.memory_space<vmem>>, vector<16x128xbf16>
    %cst = arith.constant dense<0.000000e+00> : vector<32x128xf32>
    %8 = tpu.matmul %1, %7, %cst {dimension_numbers = #tpu.dot_dimension_numbers<[1], [0], [0], [1], [0, 0, 1, 1], [], []>} : vector<32x16xbf16>, vector<16x128xbf16>, vector<32x128xf32> -> vector<32x128xf32>
    %9 = vector.broadcast %4 : vector<1x128xf32> to vector<32x128xf32>
    %10 = arith.addf %8, %9 : vector<32x128xf32>
    %11 = math.tanh %10 : vector<32x128xf32>
    %12 = arith.truncf %11 : vector<32x128xf32> to vector<32x128xbf16>
    %13 = tpu.concatenate %12, %3 in 1 : vector<32x128xbf16>, vector<32x128xbf16> -> vector<32x256xbf16>
    %c0_9 = arith.constant 0 : index
    %c0_10 = arith.constant 0 : index
    %14 = vector.load %arg4[%c0_9, %c0_10] : memref<256x128xbf16, #tpu.memory_space<vmem>>, vector<256x128xbf16>
    %cst_11 = arith.constant dense<0.000000e+00> : vector<32x128xf32>
    %15 = tpu.matmul %13, %14, %cst_11 {dimension_numbers = #tpu.dot_dimension_numbers<[1], [0], [0], [1], [0, 0, 1, 1], [], []>} : vector<32x256xbf16>, vector<256x128xbf16>, vector<32x128xf32> -> vector<32x128xf32>
    %16 = vector.broadcast %5 : vector<1x128xf32> to vector<32x128xf32>
    %17 = arith.addf %15, %16 : vector<32x128xf32>
    %18 = math.tanh %17 : vector<32x128xf32>
    %c0_12 = arith.constant 0 : index
    %c0_13 = arith.constant 0 : index
    %19 = vector.load %arg6[%c0_12, %c0_13] : memref<1x128xf32, #tpu.memory_space<vmem>>, vector<1x128xf32>
    %cst_14 = arith.constant dense<0.000000e+00> : vector<1x32xf32>
    %20 = tpu.matmul %19, %18, %cst_14 {dimension_numbers = #tpu.dot_dimension_numbers<[1], [1], [0], [0], [0, 0, 1, 0], [], []>} : vector<1x128xf32>, vector<32x128xf32>, vector<1x32xf32> -> vector<1x32xf32>
    %21 = vector.broadcast %6 : vector<1x1xf32> to vector<1x32xf32>
    %22 = arith.addf %20, %21 : vector<1x32xf32>
    %c0_15 = arith.constant 0 : index
    %c0_16 = arith.constant 0 : index
    %c0_17 = arith.constant 0 : index
    %23 = vector.load %arg7[%c0_15, %c0_16, %c0_17] : memref<1x1x32xf32, #tpu.memory_space<vmem>>, vector<1x1x32xf32>
    %24 = vector.shape_cast %23 : vector<1x1x32xf32> to vector<1x32xf32>
    %25 = vector.shape_cast %22 : vector<1x32xf32> to vector<1x1x32xf32>
    tpu.vector_store %arg7[%c0_15, %c0_16, %c0_17], %25 {strides = array<i32>} : memref<1x1x32xf32, #tpu.memory_space<vmem>>, vector<1x1x32xf32>,
    return
  }
  func.func @transform_0(%arg0: i32) -> (i32, i32) {
    %c0_i32 = arith.constant 0 : i32
    %c0_i32_0 = arith.constant 0 : i32
    return %arg0, %c0_i32 : i32, i32
  }
  func.func @transform_1(%arg0: i32) -> (i32, i32) {
    %c0_i32 = arith.constant 0 : i32
    %c0_i32_0 = arith.constant 0 : i32
    return %arg0, %c0_i32 : i32, i32
  }
  func.func @transform_2(%arg0: i32) -> (i32, i32) {
    %c0_i32 = arith.constant 0 : i32
    %c0_i32_0 = arith.constant 0 : i32
    %c0_i32_1 = arith.constant 0 : i32
    return %c0_i32, %c0_i32_0 : i32, i32
  }
  func.func @transform_3(%arg0: i32) -> (i32, i32) {
    %c0_i32 = arith.constant 0 : i32
    %c0_i32_0 = arith.constant 0 : i32
    %c0_i32_1 = arith.constant 0 : i32
    return %c0_i32, %c0_i32_0 : i32, i32
  }
  func.func @transform_4(%arg0: i32) -> (i32, i32) {
    %c0_i32 = arith.constant 0 : i32
    %c0_i32_0 = arith.constant 0 : i32
    %c0_i32_1 = arith.constant 0 : i32
    return %c0_i32, %c0_i32_0 : i32, i32
  }
  func.func @transform_5(%arg0: i32) -> (i32, i32) {
    %c0_i32 = arith.constant 0 : i32
    %c0_i32_0 = arith.constant 0 : i32
    %c0_i32_1 = arith.constant 0 : i32
    return %c0_i32, %c0_i32_0 : i32, i32
  }
  func.func @transform_6(%arg0: i32) -> (i32, i32, i32) {
    %c0_i32 = arith.constant 0 : i32
    %c0_i32_0 = arith.constant 0 : i32
    %c0_i32_1 = arith.constant 0 : i32
    return %arg0, %c0_i32, %c0_i32_0 : i32, i32, i32
  }
}

</mosaic_0001>

<bundles_post_ra>
// kernel: tpu_custom_call.1
= control target key start
LH: loop header
LB: loop body
LE: loop exit
PB: predicated region body
PF: predicated region fallthrough
CT: control target
= control target key end

     0   :  { %11 = vsyncpa [#allocation3], 0  ;;  %s1214_s0 = inlined_call_operand.vmem [shape: f32[64,128], index: 0, kind: input, shape index: {}]   ;;  %s1215_s1 = inlined_call_operand.vmem [shape: f32[64,16], index: 1, kind: input, shape index: {}]   ;;  %s1216_s2 = inlined_call_operand.vmem [shape: bf16[16,128], index: 2, kind: input, shape index: {}]   ;;  %s1217_s3 = inlined_call_operand.hbm [shape: bf16[256,128], index: 3, kind: input, shape index: {}]   ;;  %s1218_s4 = inlined_call_operand.vmem [shape: f32[3,128], index: 4, kind: input, shape index: {}]   ;;  %s1219_s5 = inlined_call_operand.vmem [shape: f32[1,128], index: 5, kind: input, shape index: {}]   ;;  %s1220_s6 = inlined_call_operand.hbm [shape: f32[2,1,32], index: 6, kind: output, shape index: {}]  }
   0x1   :  { %12 = vsyncpa [#allocation4], 0 }
   0x2   :  { %14 = vsyncpa [#allocation4 + $0x1], 0  ;;  %s1055_s21 = smov 0   ;;  %s1057_s22 = smov 0  }
   0x3   :  { %s1059_s23 = smov 0   ;;  %s1061_s24 = smov 0  }
   0x4 LB: > { %s1076_s25 = sadd.s32 4294967295, %s1010_s24   ;;  %s733_s26 = sadd.s32 4294967294, %s1010_s24   ;;  %s1010_s24 = sphi %s1061_s24, %s1236_s24   ;;  %s1006_s23 = sphi %s1059_s23, %s1235_s23   ;;  %s1002_s22 = sphi %s1057_s22, %s1234_s22   ;;  %s998_s21 = sphi %s1055_s21, %s1233_s21  }
   0x5   : > { %s1080_s27 = sadd.s32 1, %s1010_s24   ;;  %s163_s28 = sadd.s32 1, %s1006_s23 }
   0x6   : > { %s160_s29 = ssub.s32 %s1010_s24, %s1080_s27  ;;  %p173_p0 = scmp.ne.s32.totalorder %s1006_s23, %s1002_s22 }
   0x7   : > { %p161_p1 = scmp.eq.s32.totalorder %s160_s29, 0  ;;  %p174_p2 = scmp.eq.s32.totalorder %s1076_s25, 1 }
   0x8   : > { %p179_p3 = scmp.ne.s32.totalorder %s1002_s22, %s998_s21  ;;  %p180_p4 = scmp.eq.s32.totalorder %s733_s26, 1 }
   0x9   : > { %s1091_s30 = scalar_select %p161_p1, %s1006_s23, %s163_s28  }
   0xa   : > { %p1093_p5 = por %p174_p2, %p173_p0  ;;  %p1097_p6 = por %p180_p4, %p179_p3 }
   0xb   : > { %p734_p7 = scmp.ge.s32.totalorder %s1010_s24, 1  ;;  %p187_p8 = scmp.lt.s32.totalorder %s1010_s24, 3 }
   0xc   : > { %s1224_s7 = scalar_select %p1093_p5, 1, 0 }
   0xd   : > { %s1225_s8 = scalar_select %p1097_p6, 1, 0 }
   0xe   : > { %p1221_p9 = scmp.eq.s32.totalorder %s1076_s25, 0  ;;  %p1104_p10 = pnand %p734_p7, %p187_p8 }
   0xf   : > { %s1012_s10 = smov [#allocation2]   ;;  %s916_s15 = scalar_lea.hbm %s1217_s3, 2048 }
  0x10   : > { %s1226_s9 = scalar_select %p1104_p10, 1, 0 }
  0x11   : > { %s202_s11 = sshll.u32 %s1012_s10, 4  ;;  %p832_p11 = pneg %p1104_p10  ;;  %s203_s11 = int_to_ptr.vmem [resolvable:$true] %s202_s11 }
  0x12   : > { %p917_p13 = scmp.ne.s32.totalorder %s1217_s3, %s916_s15  ;;  %p923_p3 = scmp.lt.u32.totalorder %s916_s15, %s1217_s3 }
  0x13   : > { %p1112_p12 = pnand %p1221_p9, %p832_p11 }
  0x15   : > { %p918_p0 = pneg %p1112_p12 }
  0x17   : > { %p919_p1 = pnand %p918_p0, %p917_p13 }
  0x19   : > { %p920_p2 = pneg %p919_p1 }
  0x1b   : > { %p925_p4 = pnand %p923_p3, %p920_p2 }
  0x1d   : > { %928 = shalt.err (!%p925_p4)
}
  0x1e   : > { %s929_s20 = scalar_lea.vmem %s203_s11, 2048  ;;  %p937_p9 = scmp.lt.s32.totalorder %s203_s11, %s203_s11 }
  0x1f   : > { %p930_p7 = scmp.ne.s32.totalorder %s203_s11, %s929_s20  ;;  %p938_p6 = scmp.lt.s32.totalorder %s929_s20, %s929_s20 }
  0x21   : > { %p932_p8 = pnand %p930_p7, %p918_p0  ;;  %p939_p5 = por %p938_p6, %p937_p9 }
  0x23   : > { %p933_p11 = pneg %p932_p8 }
  0x25   : > { %p940_p10 = pnand %p939_p5, %p933_p11 }
  0x27   : > { %943 = shalt.err (!%p940_p10)
}
  0x28   : > { %s1013_s26 = smov 64   ;;  %s1014_s28 = smov 4  }
  0x29   : > { %835 = dma.hbm_to_vmem [thread:$0]  (!%p1112_p12), %s1217_s3, 2048, %s203_s11, [#allocation3], %s1013_s26, %s1013_s26, %s1014_s28  }
  0x2a   : > { %p1228_p13 = scmp.ne.s32.totalorder %s1226_s9, 0 }
  0x2b   : > { %p1229_p1 = scmp.eq.s32.totalorder (!%p1228_p13), %s1076_s25, 0 }
  0x2c   : > { %242 = sbr.rel (%p1228_p13) target bundleno = 767 (0x2ff), region = 44 }
  0x33   : > { %989 = dma.done.wait (%p1229_p1), [#allocation3], 2048   ;;  %p1230_p0 = pmov %p1229_p1 }
  0x34   : > { %s739_s13 = sshll.u32 %s1076_s25, 2  ;;  %v883_v0 = vld [vmem:[%s1216_s2] sm:$0xff]   ;;  %vm316_vm0 = vcmask 130048   ;;  %v886_v9 = vld [vmem:[#allocation2 + $0x48] sm:$0xff]   ;;  %v888_v11 = vld [vmem:[#allocation2 + $0x50] sm:$0xff]   ;;  %v1015_v44 = vmov 0.0|0.0  }
  0x35   : > { %991 = vsyncadd (%p1230_p0), [#allocation3], 4294965248  ;;  %p277_p5 = scmp.lt.s32.totalorder %s739_s13, 7  ;;  %803 = vmatprep.subr.bf16.mxu0 %v883_v0  ;;  %v884_v7 = vld [vmem:[#allocation2 + $0x40] sm:$0xff]   ;;  %v887_v10 = vld [vmem:[#allocation2 + $0x8] sm:$0xff]   ;;  %vm1016_vm1 = vmmov 0  }
  0x36   : > { %804 = vmatpush3.bf16.msra.mxu0 %v883_v0  ;;  %v885_v8 = vld [vmem:[#allocation2] sm:$0xff]   ;;  %770 = vmatprep.subr.bf16.mxu1 %v884_v7  ;;  %v889_v12 = vld [vmem:[#allocation2 + $0x10] sm:$0xff]   ;;  %v890_v13 = vld [vmem:[#allocation2 + $0x58] sm:$0xff]   ;;  %v1017_v45 = vmov 0.0   ;;  %v1018_v47 = vmov 0   ;;  %s274_s11 = sand.u32 1, %s1002_s22  }
  0x37   : > { %s1238_s13 = smov (!%p277_p5, %s739_s13), 7  ;;  %771 = vmatpush3.bf16.msra.mxu1 %v885_v8  ;;  %v891_v14 = vld [vmem:[#allocation2 + $0x18] sm:$0xff]   ;;  %v892_v15 = vld [vmem:[#allocation2 + $0x60] sm:$0xff]   ;;  %v894_v17 = vld [vmem:[#allocation2 + $0x68] sm:$0xff]   ;;  %820 = vmatprep.subr.bf16.mxu0 %v1015_v44  ;;  %s275_s15 = scalar_lea.vmem [#allocation5], %s274_s11  ;;  %vm639_vm2 = vcmask 253952  }
  0x38   : > { %s740_s12 = sshll.u32 %s1238_s13, 3  ;;  %772 = vmatprep.subr.bf16.mxu1 %v886_v9  ;;  %v893_v16 = vld [vmem:[#allocation2 + $0x20] sm:$0xff]   ;;  %v895_v18 = vld [vmem:[#allocation2 + $0x28] sm:$0xff]   ;;  %v896_v19 = vld [vmem:[#allocation2 + $0x70] sm:$0xff]   ;;  %882 = vset.pattern.permute.xlu0 %v1018_v47  ;;  %s654_s16 = sshll.u32 %s275_s15, 4  ;;  %s1174_s16 = int_to_ptr.vmem [resolvable:$true] %s654_s16 }
  0x39   : > { %s286_s9 = scalar_lea.vmem %s1215_s1, %s740_s12  ;;  %s280_s19 = scalar_lea.vmem %s1214_s0, %s740_s12  ;;  %v897_v21 = vld [vmem:[#allocation2 + $0x30] sm:$0xff]   ;;  %v898_v23 = vld [vmem:[#allocation2 + $0x78] sm:$0xff]   ;;  %v743_v26 = vld [vmem:[%s1218_s4] ss:$0 sm:$0xff] }
  0x3a   : > { %v289_v1 = vld [vmem:[%s286_s9] sm:$0xff]  ;;  %v290_v2 = vld [vmem:[%s286_s9 + $0x8] sm:$0xff]  ;;  %v291_v3 = vld [vmem:[%s286_s9 + $0x10] sm:$0xff]  ;;  %s642_s20 = scalar_lea.sflag [#allocation4], %s274_s11  ;;  %s944_s26 = scalar_lea.vmem %s1174_s16, 16 }
  0x3b   : > { %v293_v4 = vpack.c.bf16 %v290_v2, %v289_v1  ;;  %v292_v5 = vld [vmem:[%s286_s9 + $0x18] sm:$0xff]  ;;  %773 = vmatpush3.bf16.msra.mxu1 %v887_v10  ;;  %v295_v20 = vld [vmem:[%s280_s19] sm:$0xff]  ;;  %v296_v22 = vld [vmem:[%s280_s19 + $0x8] sm:$0xff]  ;;  %s764_s9 = sshll.u32 %s1076_s25, 4  ;;  %p945_p6 = scmp.ne.s32.totalorder %s1174_s16, %s944_s26 }
  0x3c   : > { %v294_v6 = vpack.c.bf16 %v292_v5, %v291_v3  ;;  %774 = vmatprep.subr.bf16.mxu1 %v888_v11  ;;  %v299_v24 = vpack.c.bf16 %v296_v22, %v295_v20  ;;  %v899_v25 = vld [vmem:[#allocation2 + $0x38] sm:$0xff]   ;;  %v297_v36 = vld [vmem:[%s280_s19 + $0x10] sm:$0xff]  ;;  %v303_v46 = vld [vmem:[%s1218_s4 + $0x2] sm:$0x1]  ;;  %p1231_p9 = scmp.ne.s32.totalorder %s1224_s7, 0  ;;  %s1019_s25 = smov [#allocation5]  }
  0x3d   : > { %805 = vmatprep.mubr.msk.bf16.mxu0 %vm316_vm0, %v293_v4  ;;  %v298_v37 = vld [vmem:[%s280_s19 + $0x18] sm:$0xff]  ;;  %566 = vperm.xlu0 %882, %v303_v46   ;;  %v747_v49 = vld [vmem:[%s1218_s4 + $0x1] ss:$0 sm:$0xff]  ;;  %v563_v7 = vld [vmem:[%s1219_s5] sm:$0x1]  ;;  %s1172_s19 = scalar_lea.hbm %s1220_s6, %s764_s9  ;;  %s948_s28 = sshll.u32 %s1019_s25, 4  ;;  %s949_s28 = int_to_ptr.vmem [resolvable:$false] %s948_s28 }
  0x3e   : > { %806 = vmatmul.mubr.msk.bf16.vlgmr.msra.gmra.mrb[0].mxu0 %vm316_vm0, %v294_v6  ;;  %542 = vmatprep.mubr.bf16.mxu1 %v299_v24  ;;  %v300_v41 = vpack.c.bf16 %v298_v37, %v297_v36  ;;  %p946_p10 = pnand %p945_p6, %p1231_p9  ;;  %s950_s29 = scalar_lea.vmem %s949_s28, 32 }
  0x3f   : > { %775 = vmatpush3.bf16.msra.mxu1 %v889_v12  ;;  %817 = vmatprep.mubr.msk.f32.mxu0 %vm1016_vm1, %v1017_v45  ;;  %p951_p2 = scmp.lt.s32.totalorder %s1174_s16, %s949_s28  ;;  %p952_p3 = scmp.lt.s32.totalorder %s950_s29, %s944_s26 }
  0x40   : > { %776 = vmatprep.subr.bf16.mxu1 %v890_v13  ;;  %p947_p12 = pneg %p946_p10 }
  0x41   : > { %p953_p4 = por %p952_p3, %p951_p2 }
  0x43   : > { %777 = vmatpush3.bf16.msra.mxu1 %v891_v14  ;;  %p954_p7 = pnand %p953_p4, %p947_p12 }
  0x44   : > { %778 = vmatprep.subr.bf16.mxu1 %v892_v15 }
  0x47   : > { %779 = vmatpush3.bf16.msra.mxu1 %v893_v16 }
  0x48   : > { %780 = vmatprep.subr.bf16.mxu1 %v894_v17 }
  0x4b   : > { %781 = vmatpush3.bf16.msra.mxu1 %v895_v18 }
  0x4c   : > { %782 = vmatprep.subr.bf16.mxu1 %v896_v19 }
  0x4f   : > { %783 = vmatpush3.bf16.msra.mxu1 %v897_v21 }
  0x50   : > { %784 = vmatprep.subr.bf16.mxu1 %v898_v23 }
  0x53   : > { %785 = vmatpush3.bf16.msra.mxu1 %v899_v25 }
  0xbc   : > { %v567_v8 = vpop.permute.xlu0 %566 }
 0x111   : > { %v807_v27 = vpop.f32.mrb[0].mxu0 }
 0x112   : > { %v366_v28 = vadd.f32 %v807_v27, %v743_v26  ;;  %v357_v29 = vpop.f32.mrb[1].mxu0 }
 0x113   : > { %v358_v30 = vadd.f32 %v743_v26, %v357_v29  ;;  %v808_v31 = vpop.f32.mrb[2].mxu0 }
 0x114   : > { %900 = vtanh.f32 %v366_v28  ;;  %v369_v32 = vadd.f32 %v808_v31, %v743_v26  ;;  %v360_v33 = vpop.f32.mrb[3].mxu0 }
 0x115   : > { %902 = vtanh.f32 %v358_v30  ;;  %v361_v34 = vadd.f32 %v743_v26, %v360_v33 }
 0x116   : > { %904 = vtanh.f32 %v369_v32 }
 0x117   : > { %906 = vtanh.f32 %v361_v34 }
 0x11e   : > { %v901_v35 = vpop.eup %900 }
 0x11f   : > { %v903_v38 = vpop.eup %902 }
 0x120   : > { %v905_v39 = vpop.eup %904 }
 0x121   : > { %v907_v40 = vpop.eup %906  ;;  %v377_v42 = vpack.c.bf16 %v905_v39, %v901_v35 }
 0x122   : > { %v376_v43 = vpack.c.bf16 %v907_v40, %v903_v38 }
 0x124   : > { %543 = vmatmul.mubr.bf16.vlgmr.msra.gmra.mrb[0].mxu1 %v376_v43 }
 0x125   : > { %550 = vmatprep.mubr.bf16.mxu1 %v300_v41 }
 0x12c   : > { %551 = vmatmul.mubr.bf16.gmra.mrb[4].mxu1 %v377_v42 }
 0x1f7   : > { %v786_v48 = vpop.f32.mrb[0].mxu1 }
 0x1f8   : > { %v787_v50 = vpop.f32.mrb[1].mxu1 }
 0x1f9   : > { %v788_v51 = vadd.f32 %v787_v50, %v786_v48  ;;  %v789_v52 = vpop.f32.mrb[2].mxu1 }
 0x1fa   : > { %v790_v53 = vpop.f32.mrb[3].mxu1 }
 0x1fb   : > { %v545_v54 = vadd.f32 %v788_v51, %v747_v49  ;;  %v791_v55 = vadd.f32 %v790_v53, %v789_v52 }
 0x1fd   : > { %v548_v56 = vadd.f32 %v791_v55, %v747_v49  ;;  %908 = vtanh.f32 %v545_v54 }
 0x1ff   : > { %910 = vtanh.f32 %v548_v56  ;;  %v792_v57 = vpop.f32.mrb[4].mxu1 }
 0x200   : > { %v793_v58 = vpop.f32.mrb[5].mxu1 }
 0x201   : > { %v794_v59 = vadd.f32 %v793_v58, %v792_v57  ;;  %v795_v60 = vpop.f32.mrb[6].mxu1 }
 0x202   : > { %v796_v61 = vpop.f32.mrb[7].mxu1 }
 0x203   : > { %v553_v62 = vadd.f32 %v794_v59, %v747_v49  ;;  %v797_v63 = vadd.f32 %v796_v61, %v795_v60 }
 0x205   : > { %v556_v0 = vadd.f32 %v797_v63, %v747_v49  ;;  %912 = vtanh.f32 %v553_v62 }
 0x207   : > { %914 = vtanh.f32 %v556_v0  ;;  %v909_v1 = vpop.eup %908 }
 0x209   : > { %v911_v2 = vpop.eup %910 }
 0x20a   : > { %v821_v3 = vpack.c.bf16 %v911_v2, %v909_v1 }
 0x20c   : > { %822 = vmatpush3.bf16.xpose.msra.mxu0 %v821_v3 }
 0x20d   : > { %823 = vmatprep.subr.bf16.mxu0 %v1015_v44 }
 0x20f   : > { %v913_v4 = vpop.eup %912 }
 0x211   : > { %v915_v5 = vpop.eup %914 }
 0x212   : > { %v824_v6 = vpack.c.bf16 %v915_v5, %v913_v4 }
 0x214   : > { %825 = vmatpush3.bf16.xpose.msra.mxu0 %v824_v6 }
 0x21b   : > { %818 = vmatmul.mubr.f32.vlgmr.msra.gmra.mrb[4].mxu0 %v563_v7 }
 0x2ee   : > { %v635_v9 = vpop.f32.mrb[4].mxu0 }
 0x2ef   : > { %v636_v10 = vadd.f32 %v635_v9, %v567_v8  ;;  %v819_v11 = vpop.f32.mrb[5].mxu0 }
 0x2f1   : > { %640 = vst.msk [vmem:[%s275_s15] sm:$0x1] %vm639_vm2, %v636_v10 }
 0x2f2   : > { %957 = shalt.err (!%p954_p7)
}
 0x2f3   : > { %s958_s10 = scalar_lea.hbm %s1172_s19, 16  ;;  %s962_s14 = scalar_lea.hbm %s1220_s6, 32 }
 0x2f4   : > { %p959_p8 = scmp.ne.s32.totalorder %s1172_s19, %s958_s10  ;;  %p963_p1 = scmp.lt.u32.totalorder %s1172_s19, %s1220_s6 }
 0x2f5   : > { %p964_p0 = scmp.lt.u32.totalorder %s962_s14, %s958_s10  ;;  %p966_p6 = scmp.lt.u32.totalorder %s958_s10, %s1172_s19 }
 0x2f6   : > { %p960_p11 = pnand %p959_p8, %p1231_p9 }
 0x2f7   : > { %p965_p5 = por %p964_p0, %p963_p1 }
 0x2f8   : > { %p961_p13 = pneg %p960_p11 }
 0x2f9   : > { %p967_p10 = por %p966_p6, %p965_p5 }
 0x2fb   : > { %p968_p12 = pnand %p967_p10, %p961_p13 }
 0x2fd   : > { %971 = shalt.err (!%p968_p12)
}
 0x2fe   : > { %830 = dma.vmem_to_hbm [thread:$0]  (%p1231_p9), %s1174_s16, 16, %s1172_s19, %s642_s20  }
 0x2ff PF: > { %p842_p2 = scmp.ge.s32.totalorder %s1010_s24, 2  ;;  %s666_s15 = sand.u32 1, %s998_s21  }
 0x300   : > { %p1232_p3 = scmp.ne.s32.totalorder %s1225_s8, 0  ;;  %s667_s17 = scalar_lea.sflag [#allocation4], %s666_s15 }
 0x302   : > { %p837_p4 = pnand %p842_p2, %p1232_p3 }
 0x304   : > { %993 = dma.done.wait (!%p837_p4), %s667_s17, 16  }
 0x305   : > { %995 = vsyncadd (!%p837_p4), %s667_s17, 4294967280  ;;  %p17_p7 = scmp.ge.s32.totalorder %s1080_s27, 4   ;;  %s1233_s21 = smov %s1002_s22 }
 0x306   : > { %s1234_s22 = smov %s1006_s23  ;;  %s1235_s23 = smov %s1091_s30 }
 0x307   : > { %s1236_s24 = smov %s1080_s27  ;;  %19 = sbr.rel (!%p17_p7) target bundleno = 4 (0x4), region = 87 }
 0x30e   :  { %671 = vsyncpa [#allocation3], 1 }
 0x30f   :  { %673 = vsyncpa [#allocation3 + $0x1], 1 }
 0x310   :  { %674 = vsyncpa [#allocation4], 1 }
 0x311   :  { %676 = vsyncpa [#allocation4 + $0x1], 1 }

</bundles_post_ra>
